<compile_context>
chip_gen: v6e
topology: v6e:2x2x1
jax: 0.10.0
libtpu: 0.0.40
codegen_flags: <defaults>
</compile_context>

<pallas_src>
import math

import jax
import jax.numpy as jnp
from jax.experimental import pallas as pl
from jax.experimental.pallas import tpu as pltpu

HIDDEN = 20          # hidden_layers
IN_FEATURES = 5      # LSTMCell(5, hidden)
OUT_FEATURES = 8     # num_output_features

GATE_W = 128         # each kept gate (i, g, o) owns one 128-lane slab
PACK_W = 3 * GATE_W  # 384: packed gate-weight width
K1 = 8               # augmented cell-1 input width: 5 features + 1 bias lane + 2 pad
K2 = 32              # contraction width for the h -> gates matmuls (>= HIDDEN+1, 8-aligned)

WEIGHT_DTYPE = jnp.bfloat16

# Row offsets inside packed_main (40, 384); every block is 8-sublane aligned.
_W1_R = 0                        # rows 0:8   : x  -> gates (5 real rows, bias in row 5)
_W2_R = K1                       # rows 8:40  : h  -> gates (20 real rows, bias in row 20)
_PACK_MAIN_ROWS = K1 + K2        # 40
_PACK_LIN_ROWS = K2              # packed_lin (32, 128): linear (20 real rows, bias row 20)


def _lstm_service_kernel(x_ref, pm_ref, plin_ref, out_ref):
    # x is pre-augmented in the wrapper: cols 0:5 = features, col 5 = 1.0 (drives the
    # packed bias rows), cols 6:8 = 0.
    x = x_ref[...].astype(jnp.bfloat16)                         # (B, 8)

    w1 = pm_ref[_W1_R:_W1_R + K1, :]                            # (8, 384)  bf16
    w2 = pm_ref[_W2_R:_W2_R + K2, :]                            # (32, 384) bf16, rows>=21 zero
    wl = plin_ref[...]                                          # (32, 128) bf16, cols>=8 zero

    # Constant one-hot at lane HIDDEN: appends a "1" to h so the bias rows of w2 / wl ride
    # the matmul itself (no separate bias adds, no 1-row bias slices).
    one_lane = (jax.lax.broadcasted_iota(jnp.int32, (1, GATE_W), 1) == HIDDEN
                ).astype(jnp.float32)                           # (1, 128)

    def aug(h):                                                 # (B,128) f32 -> (B,32) bf16
        return (h + one_lane)[:, :K2].astype(jnp.bfloat16)

    def cell(inp_bf16, w):
        # Gate layout [ i | g | o ]: one 128-lane slab per kept gate (dead f-gate pruned —
        # it only multiplies c_prev == 0).  All slices below are vreg-aligned.
        gates = jnp.dot(inp_bf16, w, preferred_element_type=jnp.float32)   # (B, 384) f32
        i = jax.nn.sigmoid(gates[:, 0:GATE_W])
        g = jnp.tanh(gates[:, GATE_W:2 * GATE_W])
        o = jax.nn.sigmoid(gates[:, 2 * GATE_W:3 * GATE_W])
        # Padding lanes see gates == 0 -> i = 0.5, g = 0 -> h padding is exactly 0, which
        # keeps the K2-wide contraction of the next matmul exact.
        return o * jnp.tanh(i * g)                                          # (B, 128) f32

    h1 = cell(x, w1)
    h2 = cell(aug(h1), w2)
    h3 = cell(aug(h2), w2)        # the PyTorch forward reuses lstm2 for step 3
    # TODO(synk): relying on Mosaic to keep the shared w2 RHS resident in the MXU between
    # the h2/h3 matmuls; explicit pltpu.matmul_push_rhs driving was not adopted.

    # Lane-dense (B, 128) store (unmasked vst); cols >= 8 are exactly zero (wl cols zero).
    out_ref[...] = jnp.dot(aug(h3), wl, preferred_element_type=jnp.float32)


def pack_params(params):
    """One-time (model-load) packing into two small bf16, VMEM-friendly slabs.

    * transpose to (in, out); fold b_ih + b_hh into an extra "bias input row" that the
      kernel drives with a constant-1 lane (biases ride the matmul)
    * drop the dead f-gate (it only multiplies c_prev == 0)
    * give each kept gate (i, g, o) its own 128-lane slab -> vreg-aligned gate slices
    * store in bf16 (native single-pass MXU path; accumulation is f32 in-kernel)
    """
    H = HIDDEN
    kept = (0, 2, 3)          # PyTorch gate order is (i, f, g, o); keep i, g, o

    def gate_block(w_ih, b_ih, b_hh, rows, bias_row):
        w_t = w_ih.T.astype(jnp.float32)                        # (in_dim, 4H)
        b = (b_ih + b_hh).astype(jnp.float32)                   # (4H,)
        blk = jnp.zeros((rows, PACK_W), jnp.float32)
        for dst, src in enumerate(kept):
            col = dst * GATE_W
            blk = blk.at[:w_t.shape[0], col:col + H].set(w_t[:, src * H:(src + 1) * H])
            blk = blk.at[bias_row, col:col + H].set(b[src * H:(src + 1) * H])
        return blk

    w1 = gate_block(params["w_ih1"], params["b_ih1"], params["b_hh1"],
                    rows=K1, bias_row=IN_FEATURES)              # (8, 384)
    w2 = gate_block(params["w_ih2"], params["b_ih2"], params["b_hh2"],
                    rows=K2, bias_row=H)                        # (32, 384)
    packed_main = jnp.concatenate([w1, w2], axis=0).astype(WEIGHT_DTYPE)

    lin = jnp.zeros((_PACK_LIN_ROWS, GATE_W), jnp.float32)      # (32, 128)
    lin = lin.at[:H, :OUT_FEATURES].set(params["w_lin"].T.astype(jnp.float32))
    lin = lin.at[H, :OUT_FEATURES].set(params["b_lin"].astype(jnp.float32))
    packed_lin = lin.astype(WEIGHT_DTYPE)

    assert packed_main.shape == (_PACK_MAIN_ROWS, PACK_W)
    assert packed_lin.shape == (_PACK_LIN_ROWS, GATE_W)
    return packed_main, packed_lin


def lstm_service_forward(y, packed_main, packed_lin, *, block_b=128):
    """Pallas implementation of LstmServiceModel.forward (packed params precomputed)."""
    # Catch mismatched packs early (review correctness concern).
    assert packed_main.shape == (_PACK_MAIN_ROWS, PACK_W), packed_main.shape
    assert packed_lin.shape == (_PACK_LIN_ROWS, GATE_W), packed_lin.shape
    assert packed_main.dtype == WEIGHT_DTYPE and packed_lin.dtype == WEIGHT_DTYPE

    if y.ndim != 3:
        y = y[None, ...]
    x = y[0].astype(jnp.float32)                                # forward reads y[0] only
    B = x.shape[0]
    # Augment x: col 5 = 1.0 drives the packed bias rows; cols 6:8 are zero padding.
    x_aug = jnp.pad(x, ((0, 0), (0, K1 - IN_FEATURES))).at[:, IN_FEATURES].set(1.0)

    if B <= block_b:
        # Tiny batch: single grid-less invocation (no pipeline prologue/epilogue).
        out = pl.pallas_call(
            _lstm_service_kernel,
            out_shape=jax.ShapeDtypeStruct((B, GATE_W), jnp.float32),
            in_specs=[pl.BlockSpec(memory_space=pltpu.MemorySpace.VMEM)] * 3,
            out_specs=pl.BlockSpec(memory_space=pltpu.MemorySpace.VMEM),
        )(x_aug, packed_main, packed_lin)
    else:
        # Large batch: 1-D parallel grid over B (both v7x TensorCores get work; the
        # parameter blocks keep the same block index so they are not re-fetched).
        out = pl.pallas_call(
            _lstm_service_kernel,
            out_shape=jax.ShapeDtypeStruct((B, GATE_W), jnp.float32),
            grid_spec=pltpu.PrefetchScalarGridSpec(
                num_scalar_prefetch=0,
                grid=(pl.cdiv(B, block_b),),
                in_specs=[
                    pl.BlockSpec((block_b, K1), lambda i: (i, 0)),
                    pl.BlockSpec((_PACK_MAIN_ROWS, PACK_W), lambda i: (0, 0)),
                    pl.BlockSpec((_PACK_LIN_ROWS, GATE_W), lambda i: (0, 0)),
                ],
                out_specs=pl.BlockSpec((block_b, GATE_W), lambda i: (i, 0)),
            ),
            compiler_params=pltpu.CompilerParams(
                dimension_semantics=("parallel",)),
        )(x_aug, packed_main, packed_lin)

    # Lane-dense store inside the kernel; cheap slice to the real 8 output features here.
    return out[:, :OUT_FEATURES]


def init_params(key):
    """Deterministic synthetic parameters mirroring the PyTorch module's shapes/init."""
    H, IN, OUT = HIDDEN, IN_FEATURES, OUT_FEATURES
    ks = jax.random.split(key, 12)
    bound = 1.0 / math.sqrt(H)

    def u(k, shape):
        return jax.random.uniform(k, shape, jnp.float32, -bound, bound)

    return {
        # lstm1 = LSTMCell(5, H)
        "w_ih1": u(ks[0], (4 * H, IN)),
        "w_hh1": u(ks[1], (4 * H, H)),   # contributes 0 (h_prev == 0)
        "b_ih1": u(ks[2], (4 * H,)),
        "b_hh1": u(ks[3], (4 * H,)),
        # lstm2 = LSTMCell(H, H)
        "w_ih2": u(ks[4], (4 * H, H)),
        "w_hh2": u(ks[5], (4 * H, H)),   # contributes 0 (h_prev == 0)
        "b_ih2": u(ks[6], (4 * H,)),
        "b_hh2": u(ks[7], (4 * H,)),
        # lstm3 is declared in __init__ but never used in forward -> omitted from compute.
        # linear = Linear(H, 8)
        "w_lin": u(ks[8], (OUT, H)),
        "b_lin": u(ks[9], (OUT,)),
    }


def _reference(y, params):
    """Pure-JAX f32 reference matching the PyTorch forward semantics exactly."""
    H = HIDDEN
    x = y[0]

    def cell(inp, w_ih, b_ih, b_hh):
        g = inp @ w_ih.T + b_ih + b_hh
        i = jax.nn.sigmoid(g[:, :H])
        gg = jnp.tanh(g[:, 2 * H:3 * H])
        o = jax.nn.sigmoid(g[:, 3 * H:])
        return o * jnp.tanh(i * gg)

    h1 = cell(x, params["w_ih1"], params["b_ih1"], params["b_hh1"])
    h2 = cell(h1, params["w_ih2"], params["b_ih2"], params["b_hh2"])
    h3 = cell(h2, params["w_ih2"], params["b_ih2"], params["b_hh2"])
    return h3 @ params["w_lin"].T + params["b_lin"]


def _reference_bf16_storage(y, params):
    """Reference with the kernel's bf16 weight/activation storage, f32 accumulation."""
    H = HIDDEN
    q = lambda a: a.astype(jnp.bfloat16)
    x = q(y[0])

    def cell(inp_b, w_ih, b_ih, b_hh):
        g = jnp.dot(inp_b, q(w_ih.T), preferred_element_type=jnp.float32)
        g = g + q(b_ih + b_hh).astype(jnp.float32)
        i = jax.nn.sigmoid(g[:, :H])
        gg = jnp.tanh(g[:, 2 * H:3 * H])
        o = jax.nn.sigmoid(g[:, 3 * H:])
        return o * jnp.tanh(i * gg)

    h1 = cell(x, params["w_ih1"], params["b_ih1"], params["b_hh1"])
    h2 = cell(q(h1), params["w_ih2"], params["b_ih2"], params["b_hh2"])
    h3 = cell(q(h2), params["w_ih2"], params["b_ih2"], params["b_hh2"])
    return (jnp.dot(q(h3), q(params["w_lin"].T), preferred_element_type=jnp.float32)
            + q(params["b_lin"]).astype(jnp.float32))


if __name__ == "__main__":
    key = jax.random.PRNGKey(0)
    pkey, xkey, xkey2 = jax.random.split(key, 3)
    params = init_params(pkey)
    packed_main, packed_lin = jax.block_until_ready(pack_params(params))  # once, at load

    # Tiny batch (grid-less path): y = (seq=8, batch=2, features=5); forward reads y[0].
    y = jax.random.normal(xkey, (8, 2, IN_FEATURES), dtype=jnp.float32)
    out = jax.block_until_ready(lstm_service_forward(y, packed_main, packed_lin))
    assert out.shape == (2, OUT_FEATURES)
    # Tight check vs a reference with identical bf16 storage (validates kernel mechanics).
    assert jnp.allclose(out, _reference_bf16_storage(y, params), atol=3e-3, rtol=3e-3)
    # Loose check vs the exact f32 semantics (deliberate bf16-storage error budget).
    assert jnp.allclose(out, _reference(y, params), atol=5e-2, rtol=5e-2)

    # Large batch (1-D "parallel" grid over B; exercises the v7x two-TensorCore path).
    y_big = jax.random.normal(xkey2, (1, 256, IN_FEATURES), dtype=jnp.float32)
    out_big = jax.block_until_ready(lstm_service_forward(y_big, packed_main, packed_lin))
    assert out_big.shape == (256, OUT_FEATURES)
    assert jnp.allclose(out_big, _reference_bf16_storage(y_big, params), atol=3e-3, rtol=3e-3)
    assert jnp.allclose(out_big, _reference(y_big, params), atol=5e-2, rtol=5e-2)

    print("KERNEL_OK")
</pallas_src>

<mosaic_0001>
module attributes {stable_mosaic.version = 11 : i64} {
  func.func @_lstm_service_kernel(%arg0: memref<2x8xf32, #tpu.memory_space<vmem>>, %arg1: memref<40x384xbf16, #tpu.memory_space<vmem>>, %arg2: memref<32x128xbf16, #tpu.memory_space<vmem>>, %arg3: memref<2x128xf32, #tpu.memory_space<vmem>>) attributes {dimension_semantics = [], scalar_prefetch = 0 : i64, scratch_operands = 0 : i64, tpu.core_type = #tpu.core_type<tc>} {
    %c0 = arith.constant 0 : index
    %c0_0 = arith.constant 0 : index
    %0 = vector.load %arg0[%c0, %c0_0] : memref<2x8xf32, #tpu.memory_space<vmem>>, vector<2x8xf32>
    %1 = arith.truncf %0 : vector<2x8xf32> to vector<2x8xbf16>
    %c0_1 = arith.constant 0 : index
    %c0_2 = arith.constant 0 : index
    %2 = vector.load %arg1[%c0_1, %c0_2] : memref<40x384xbf16, #tpu.memory_space<vmem>>, vector<8x384xbf16>
    %c8 = arith.constant 8 : index
    %c0_3 = arith.constant 0 : index
    %3 = vector.load %arg1[%c8, %c0_3] : memref<40x384xbf16, #tpu.memory_space<vmem>>, vector<32x384xbf16>
    %c0_4 = arith.constant 0 : index
    %c0_5 = arith.constant 0 : index
    %4 = vector.load %arg2[%c0_4, %c0_5] : memref<32x128xbf16, #tpu.memory_space<vmem>>, vector<32x128xbf16>
    %5 = tpu.iota {dimensions = array<i32: 1>} : vector<1x128xi32>
    %c20_i32 = arith.constant 20 : i32
    %6 = vector.broadcast %c20_i32 : i32 to vector<1x128xi32>
    %7 = arith.cmpi eq, %5, %6 : vector<1x128xi32>
    %8 = arith.extui %7 : vector<1x128xi1> to vector<1x128xi32>
    %9 = arith.sitofp %8 : vector<1x128xi32> to vector<1x128xf32>
    %cst = arith.constant dense<0.000000e+00> : vector<2x384xf32>
    %10 = tpu.matmul %1, %2, %cst {dimension_numbers = #tpu.dot_dimension_numbers<[1], [0], [0], [1], [0, 0, 1, 1], [], []>} : vector<2x8xbf16>, vector<8x384xbf16>, vector<2x384xf32> -> vector<2x384xf32>
    %11 = vector.extract_strided_slice %10 {offsets = [0, 0], sizes = [2, 128], strides = [1, 1]} : vector<2x384xf32> to vector<2x128xf32>
    %12 = arith.negf %11 : vector<2x128xf32>
    %13 = math.exp %12 : vector<2x128xf32>
    %cst_6 = arith.constant 1.000000e+00 : f32
    %14 = vector.broadcast %cst_6 : f32 to vector<2x128xf32>
    %15 = arith.addf %14, %13 : vector<2x128xf32>
    %16 = arith.divf %14, %15 : vector<2x128xf32>
    %17 = vector.extract_strided_slice %10 {offsets = [0, 128], sizes = [2, 128], strides = [1, 1]} : vector<2x384xf32> to vector<2x128xf32>
    %18 = math.tanh %17 : vector<2x128xf32>
    %19 = vector.extract_strided_slice %10 {offsets = [0, 256], sizes = [2, 128], strides = [1, 1]} : vector<2x384xf32> to vector<2x128xf32>
    %20 = arith.negf %19 : vector<2x128xf32>
    %21 = math.exp %20 : vector<2x128xf32>
    %cst_7 = arith.constant 1.000000e+00 : f32
    %22 = vector.broadcast %cst_7 : f32 to vector<2x128xf32>
    %23 = arith.addf %22, %21 : vector<2x128xf32>
    %24 = arith.divf %22, %23 : vector<2x128xf32>
    %25 = arith.mulf %16, %18 : vector<2x128xf32>
    %26 = math.tanh %25 : vector<2x128xf32>
    %27 = arith.mulf %24, %26 : vector<2x128xf32>
    %28 = vector.broadcast %9 : vector<1x128xf32> to vector<2x128xf32>
    %29 = arith.addf %27, %28 : vector<2x128xf32>
    %30 = vector.extract_strided_slice %29 {offsets = [0, 0], sizes = [2, 32], strides = [1, 1]} : vector<2x128xf32> to vector<2x32xf32>
    %31 = arith.truncf %30 : vector<2x32xf32> to vector<2x32xbf16>
    %cst_8 = arith.constant dense<0.000000e+00> : vector<2x384xf32>
    %32 = tpu.matmul %31, %3, %cst_8 {dimension_numbers = #tpu.dot_dimension_numbers<[1], [0], [0], [1], [0, 0, 1, 1], [], []>} : vector<2x32xbf16>, vector<32x384xbf16>, vector<2x384xf32> -> vector<2x384xf32>
    %33 = vector.extract_strided_slice %32 {offsets = [0, 0], sizes = [2, 128], strides = [1, 1]} : vector<2x384xf32> to vector<2x128xf32>
    %34 = arith.negf %33 : vector<2x128xf32>
    %35 = math.exp %34 : vector<2x128xf32>
    %cst_9 = arith.constant 1.000000e+00 : f32
    %36 = vector.broadcast %cst_9 : f32 to vector<2x128xf32>
    %37 = arith.addf %36, %35 : vector<2x128xf32>
    %38 = arith.divf %36, %37 : vector<2x128xf32>
    %39 = vector.extract_strided_slice %32 {offsets = [0, 128], sizes = [2, 128], strides = [1, 1]} : vector<2x384xf32> to vector<2x128xf32>
    %40 = math.tanh %39 : vector<2x128xf32>
    %41 = vector.extract_strided_slice %32 {offsets = [0, 256], sizes = [2, 128], strides = [1, 1]} : vector<2x384xf32> to vector<2x128xf32>
    %42 = arith.negf %41 : vector<2x128xf32>
    %43 = math.exp %42 : vector<2x128xf32>
    %cst_10 = arith.constant 1.000000e+00 : f32
    %44 = vector.broadcast %cst_10 : f32 to vector<2x128xf32>
    %45 = arith.addf %44, %43 : vector<2x128xf32>
    %46 = arith.divf %44, %45 : vector<2x128xf32>
    %47 = arith.mulf %38, %40 : vector<2x128xf32>
    %48 = math.tanh %47 : vector<2x128xf32>
    %49 = arith.mulf %46, %48 : vector<2x128xf32>
    %50 = vector.broadcast %9 : vector<1x128xf32> to vector<2x128xf32>
    %51 = arith.addf %49, %50 : vector<2x128xf32>
    %52 = vector.extract_strided_slice %51 {offsets = [0, 0], sizes = [2, 32], strides = [1, 1]} : vector<2x128xf32> to vector<2x32xf32>
    %53 = arith.truncf %52 : vector<2x32xf32> to vector<2x32xbf16>
    %cst_11 = arith.constant dense<0.000000e+00> : vector<2x384xf32>
    %54 = tpu.matmul %53, %3, %cst_11 {dimension_numbers = #tpu.dot_dimension_numbers<[1], [0], [0], [1], [0, 0, 1, 1], [], []>} : vector<2x32xbf16>, vector<32x384xbf16>, vector<2x384xf32> -> vector<2x384xf32>
    %55 = vector.extract_strided_slice %54 {offsets = [0, 0], sizes = [2, 128], strides = [1, 1]} : vector<2x384xf32> to vector<2x128xf32>
    %56 = arith.negf %55 : vector<2x128xf32>
    %57 = math.exp %56 : vector<2x128xf32>
    %cst_12 = arith.constant 1.000000e+00 : f32
    %58 = vector.broadcast %cst_12 : f32 to vector<2x128xf32>
    %59 = arith.addf %58, %57 : vector<2x128xf32>
    %60 = arith.divf %58, %59 : vector<2x128xf32>
    %61 = vector.extract_strided_slice %54 {offsets = [0, 128], sizes = [2, 128], strides = [1, 1]} : vector<2x384xf32> to vector<2x128xf32>
    %62 = math.tanh %61 : vector<2x128xf32>
    %63 = vector.extract_strided_slice %54 {offsets = [0, 256], sizes = [2, 128], strides = [1, 1]} : vector<2x384xf32> to vector<2x128xf32>
    %64 = arith.negf %63 : vector<2x128xf32>
    %65 = math.exp %64 : vector<2x128xf32>
    %cst_13 = arith.constant 1.000000e+00 : f32
    %66 = vector.broadcast %cst_13 : f32 to vector<2x128xf32>
    %67 = arith.addf %66, %65 : vector<2x128xf32>
    %68 = arith.divf %66, %67 : vector<2x128xf32>
    %69 = arith.mulf %60, %62 : vector<2x128xf32>
    %70 = math.tanh %69 : vector<2x128xf32>
    %71 = arith.mulf %68, %70 : vector<2x128xf32>
    %72 = vector.broadcast %9 : vector<1x128xf32> to vector<2x128xf32>
    %73 = arith.addf %71, %72 : vector<2x128xf32>
    %74 = vector.extract_strided_slice %73 {offsets = [0, 0], sizes = [2, 32], strides = [1, 1]} : vector<2x128xf32> to vector<2x32xf32>
    %75 = arith.truncf %74 : vector<2x32xf32> to vector<2x32xbf16>
    %cst_14 = arith.constant dense<0.000000e+00> : vector<2x128xf32>
    %76 = tpu.matmul %75, %4, %cst_14 {dimension_numbers = #tpu.dot_dimension_numbers<[1], [0], [0], [1], [0, 0, 1, 1], [], []>} : vector<2x32xbf16>, vector<32x128xbf16>, vector<2x128xf32> -> vector<2x128xf32>
    %c0_15 = arith.constant 0 : index
    %c0_16 = arith.constant 0 : index
    %77 = vector.load %arg3[%c0_15, %c0_16] : memref<2x128xf32, #tpu.memory_space<vmem>>, vector<2x128xf32>
    tpu.vector_store %arg3[%c0_15, %c0_16], %76 {strides = array<i32>} : memref<2x128xf32, #tpu.memory_space<vmem>>, vector<2x128xf32>,
    return
  }
}

</mosaic_0001>

<bundles_post_ra>
// kernel: tpu_custom_call.1
= control target key start
LH: loop header
LB: loop body
LE: loop exit
PB: predicated region body
PF: predicated region fallthrough
CT: control target
= control target key end

     0   :  { %8 = vsyncpa [#allocation3], 0  ;;  %s791_s0 = inlined_call_operand.hbm [shape: f32[2,8], index: 0, kind: input, shape index: {}]   ;;  %s792_s1 = inlined_call_operand.hbm [shape: bf16[40,384], index: 1, kind: input, shape index: {}]   ;;  %s793_s2 = inlined_call_operand.hbm [shape: bf16[32,128], index: 2, kind: input, shape index: {}]   ;;  %s794_s3 = inlined_call_operand.hbm [shape: f32[2,128], index: 3, kind: output, shape index: {}]  }
   0x1   :  { %9 = vsyncpa [#allocation6], 0 }
   0x2   :  { %10 = vsyncpa [#allocation4], 0  ;;  %s719_s12 = smov [#allocation5]  }
   0x3   :  { %s26_s13 = sshll.u32 %s719_s12, 4  ;;  %s27_s13 = int_to_ptr.vmem [resolvable:$true] %s26_s13 }
   0x4   :  { %s641_s14 = scalar_lea.vmem %s27_s13, 960  ;;  %p646_p1 = scmp.lt.s32.totalorder %s27_s13, %s27_s13 }
   0x5   :  { %p642_p0 = scmp.ne.s32.totalorder %s27_s13, %s641_s14  ;;  %p647_p2 = scmp.lt.s32.totalorder %s641_s14, %s641_s14 }
   0x7   :  { %p648_p3 = por %p647_p2, %p646_p1 }
   0x9   :  { %p649_p4 = pnand %p648_p3, %p642_p0 }
   0xb   :  { %652 = shalt.err (!%p649_p4)
}
   0xc   :  { %s720_s15 = smov 192   ;;  %s721_s16 = smov 12  }
   0xd   :  { %32 = dma.hbm_to_vmem [thread:$0]  %s792_s1, 960, %s27_s13, [#allocation6], %s720_s15, %s720_s15, %s721_s16  }
   0xe   :  { %s722_s19 = smov [#allocation2]   ;;  %s723_s21 = smov [#allocation7]  }
   0xf   :  { %s17_s20 = sshll.u32 %s722_s19, 4  ;;  %s38_s22 = sshll.u32 %s723_s21, 4  ;;  %s18_s20 = int_to_ptr.vmem [resolvable:$true] %s17_s20  ;;  %s39_s22 = int_to_ptr.vmem [resolvable:$true] %s38_s22 }
  0x10   :  { %s661_s23 = scalar_lea.vmem %s18_s20, 32  ;;  %p666_p6 = scmp.lt.s32.totalorder %s18_s20, %s18_s20 }
  0x11   :  { %p662_p5 = scmp.ne.s32.totalorder %s18_s20, %s661_s23  ;;  %p667_p7 = scmp.lt.s32.totalorder %s661_s23, %s661_s23 }
  0x13   :  { %p668_p8 = por %p667_p7, %p666_p6 }
  0x15   :  { %p669_p9 = pnand %p668_p8, %p662_p5 }
  0x17   :  { %672 = shalt.err (!%p669_p9)
}
  0x18   :  { %20 = dma.hbm_to_vmem [thread:$0]  %s791_s0, 32, %s18_s20, [#allocation3]  }
  0x19   :  { %s681_s26 = scalar_lea.vmem %s39_s22, 256  ;;  %p686_p11 = scmp.lt.s32.totalorder %s39_s22, %s39_s22 }
  0x1a   :  { %p682_p10 = scmp.ne.s32.totalorder %s39_s22, %s681_s26  ;;  %p687_p12 = scmp.lt.s32.totalorder %s681_s26, %s681_s26 }
  0x1c   :  { %p688_p13 = por %p687_p12, %p686_p11 }
  0x1e   :  { %p689_p0 = pnand %p688_p13, %p682_p10 }
  0x20   :  { %692 = shalt.err (!%p689_p0)
}
  0x21   :  { %s724_s1 = smov 64   ;;  %s725_s27 = smov 4  }
  0x22   :  { %44 = dma.hbm_to_vmem [thread:$0]  %s793_s2, 256, %s39_s22, [#allocation6], %s724_s1, %s724_s1, %s725_s27  }
  0x23   :  { %713 = dma.done.wait [#allocation3], 32  }
  0x24   :  { %714 = vsyncadd [#allocation3], 4294967264 }
  0x25   :  { %715 = dma.done.wait [#allocation6], 1216  }
  0x26   :  { %716 = vsyncadd [#allocation6], 4294966080  ;;  %v726_v0 = vmov 0   ;;  %v727_v1 = vmov 0.0   ;;  %vm728_vm0 = vmmov 0   ;;  %v57_v2 = vld [vmem:[#allocation5] sm:$0xff]  ;;  %v71_v33 = vlaneseq }
  0x27   :  { %130 = vmatprep.mubr.bf16.mxu0 %v726_v0  ;;  %543 = vmatprep.subr.bf16.mxu1 %v727_v1  ;;  %vm88_vm1 = vcmask 1043456   ;;  %v55_v3 = vld [vmem:[#allocation2] sm:$0x3]  ;;  %v508_v4 = vcombine.high %v57_v2, %v57_v2  ;;  %v507_v5 = vcombine.low %v57_v2, %v57_v2  ;;  %v586_v6 = vld [vmem:[#allocation5 + $0x8] ss:$0 sps:$4 sm:$0xff]   ;;  %vm84_vm2 = vcmask 64512  }
  0x28   :  { %545 = vmatprep.mubr.msk.bf16.mxu1 %vm728_vm0, %v727_v1  ;;  %v56_v8 = vpack.c.bf16 %v55_v3, %v55_v3  ;;  %v96_v9 = vsel %vm88_vm1, %v586_v6, 0  ;;  %v587_v10 = vld [vmem:[#allocation5 + $0x24] ss:$12 sps:$4 sm:$0xff]   ;;  %v589_v11 = vld [vmem:[#allocation5 + $0x28] ss:$12 sps:$4 sm:$0xff]   ;;  %v72_v34 = vand.u32 127, %v71_v33 }
  0x29   :  { %510 = vmatprep.subr.msk.bf16.mxu0 %vm88_vm1, %v508_v4  ;;  %v90_v7 = vsel %vm88_vm1, %v507_v5, 0  ;;  %544 = vmatpush3.bf16.msra.mxu1 %v96_v9  ;;  %v590_v12 = vld [vmem:[#allocation5 + $0x2c] ss:$12 sps:$4 sm:$0xff]   ;;  %v593_v13 = vld [vmem:[#allocation5 + $0x10] ss:$12 sps:$4 sm:$0xff]   ;;  %vm229_vm4 = vcmask 261120  }
  0x2a   :  { %113 = vmatpush1.bf16.msra.mxu0 %v90_v7  ;;  %549 = vmatprep.subr.bf16.mxu1 %v727_v1  ;;  %v594_v14 = vld [vmem:[#allocation5 + $0x14] ss:$12 sps:$4 sm:$0xff]   ;;  %v591_v15 = vld [vmem:[#allocation5 + $0xc] ss:$12 sps:$4 sm:$0xff]   ;;  %vm73_vm3 = vcmp.eq.s32.totalorder %v72_v34, 20  ;;  %v595_v63 = vld [vmem:[#allocation7 + $0x8] sm:$0xff]  }
  0x2b   :  { %245 = vmatprep.subr.bf16.mxu0 %v589_v11  ;;  %v770_v37 = vsel %vm73_vm3, 1.0, %v727_v1  ;;  %s729_s0 = smov [#allocation8]  }
  0x2c   :  { %546 = vmatmul.mubr.msk.bf16.vlgmr.msra.gmra.mxu1 %vm84_vm2, %v56_v8  ;;  %s496_s2 = sshll.u32 %s729_s0, 4  ;;  %s497_s2 = int_to_ptr.vmem [resolvable:$true] %s496_s2 }
  0x2d   :  { %511 = vmatmul.mubr.msk.bf16.vlgmr.msra.gmra.mxu0 %vm84_vm2, %v56_v8  ;;  %553 = vmatprep.mubr.msk.bf16.mxu1 %vm728_vm0, %v727_v1  ;;  %s693_s30 = scalar_lea.vmem %s497_s2, 32  ;;  %p698_p2 = scmp.lt.s32.totalorder %s497_s2, %s497_s2 }
  0x2e   :  { %265 = vmatprep.mubr.bf16.mxu0 %v726_v0  ;;  %550 = vmatpush3.bf16.msra.mxu1 %v590_v12  ;;  %p694_p1 = scmp.ne.s32.totalorder %s497_s2, %s693_s30  ;;  %p699_p3 = scmp.lt.s32.totalorder %s693_s30, %s693_s30 }
  0x2f   :  { %246 = vmatpush1.bf16.msra.mxu0 %v587_v10  ;;  %551 = vmatprep.subr.bf16.mxu1 %v727_v1 }
  0x30   :  { %247 = vmatprep.subr.bf16.mxu0 %v593_v13  ;;  %p700_p4 = por %p699_p3, %p698_p2 }
  0x32   :  { %552 = vmatpush3.bf16.msra.mxu1 %v594_v14  ;;  %p701_p5 = pnand %p700_p4, %p694_p1 }
  0x33   :  { %248 = vmatpush1.bf16.msra.mxu0 %v591_v15  ;;  %557 = vmatprep.subr.bf16.mxu1 %v727_v1 }
  0x34   :  { %347 = vmatprep.subr.bf16.mxu0 %v589_v11 }
  0xec   :  { %v173_v17 = vpop.f32.mrf.mxu1 }
  0xed   :  { %v132_v16 = vpop.f32.mrf.mxu0  ;;  %v514_v25 = vmul.f32 -1.442695, %v173_v17 }
  0xee   :  { %v513_v18 = vmul.f32 -1.442695, %v132_v16  ;;  %v547_v20 = vpop.f32.mrf.mxu1 }
  0xef   :  { %v134_v19 = vpop.f32.mrf.mxu0 }
  0xf0   :  { %597 = vpow2.f32 %v513_v18  ;;  %v176_v22 = vpop.f32.mrf.mxu1 }
  0xf1   :  { %v136_v21 = vpop.f32.mrf.mxu0  ;;  %599 = vpow2.f32 %v514_v25 }
  0xf2   :  { %v548_v24 = vpop.f32.mrf.mxu1  ;;  %601 = vtanh.f32 %v134_v19 }
  0xf3   :  { %v137_v23 = vpop.f32.mrf.mxu0 }
  0xfd   :  { %v598_v26 = vpop.eup %597 }
  0xfe   :  { %v182_v27 = vadd.f32 1.0, %v598_v26  ;;  %v600_v28 = vpop.eup %599 }
  0xff   :  { %v189_v29 = vadd.f32 1.0, %v600_v28  ;;  %v602_v30 = vpop.eup %601 }
 0x100   :  { %603 = vrcp.f32 %v182_v27 }
 0x101   :  { %605 = vrcp.f32 %v189_v29 }
 0x10d   :  { %v604_v31 = vpop.eup %603 }
 0x10e   :  { %v192_v32 = vmul.f32 %v604_v31, %v602_v30  ;;  %v606_v35 = vpop.eup %605 }
 0x110   :  { %607 = vtanh.f32 %v192_v32 }
 0x11d   :  { %v608_v36 = vpop.eup %607 }
 0x11e   :  { %v194_v38 = vmul.f32 %v608_v36, %v606_v35 }
 0x120   :  { %v195_v39 = vadd.f32 %v770_v37, %v194_v38 }
 0x122   :  { %v196_v40 = vpack.c.bf16 %v195_v39, %v195_v39 }
 0x124   :  { %521 = vmatmul.mubr.msk.bf16.vlgmr.msra.gmra.mxu0 %vm229_vm4, %v196_v40  ;;  %554 = vmatmul.mubr.msk.bf16.vlgmr.msra.gmra.mxu1 %vm229_vm4, %v196_v40 }
 0x125   :  { %348 = vmatpush1.bf16.msra.mxu0 %v587_v10  ;;  %558 = vmatpush3.bf16.msra.mxu1 %v590_v12 }
 0x126   :  { %349 = vmatprep.subr.bf16.mxu0 %v593_v13  ;;  %559 = vmatprep.subr.bf16.mxu1 %v727_v1 }
 0x127   :  { %367 = vmatprep.mubr.bf16.mxu0 %v726_v0  ;;  %561 = vmatprep.mubr.msk.bf16.mxu1 %vm728_vm0, %v727_v1  ;;  %v596_v0 = vld [vmem:[#allocation7] sm:$0xff]  }
 0x129   :  { %350 = vmatpush1.bf16.msra.mxu0 %v591_v15  ;;  %560 = vmatpush3.bf16.msra.mxu1 %v594_v14 }
 0x12a   :  { %565 = vmatprep.subr.bf16.mxu0 %v727_v1 }
 0x1e4   :  { %v267_v41 = vpop.f32.mrf.mxu0  ;;  %v308_v42 = vpop.f32.mrf.mxu1 }
 0x1e5   :  { %v523_v43 = vmul.f32 -1.442695, %v267_v41  ;;  %v524_v50 = vmul.f32 -1.442695, %v308_v42 }
 0x1e6   :  { %v269_v44 = vpop.f32.mrf.mxu0  ;;  %v555_v45 = vpop.f32.mrf.mxu1 }
 0x1e7   :  { %609 = vpow2.f32 %v523_v43 }
 0x1e8   :  { %v271_v46 = vpop.f32.mrf.mxu0  ;;  %v311_v47 = vpop.f32.mrf.mxu1  ;;  %611 = vpow2.f32 %v524_v50 }
 0x1e9   :  { %613 = vtanh.f32 %v269_v44 }
 0x1ea   :  { %v272_v48 = vpop.f32.mrf.mxu0  ;;  %v556_v49 = vpop.f32.mrf.mxu1 }
 0x1f4   :  { %v610_v51 = vpop.eup %609 }
 0x1f5   :  { %v317_v52 = vadd.f32 1.0, %v610_v51  ;;  %v612_v53 = vpop.eup %611 }
 0x1f6   :  { %v324_v54 = vadd.f32 1.0, %v612_v53  ;;  %v614_v55 = vpop.eup %613 }
 0x1f7   :  { %615 = vrcp.f32 %v317_v52 }
 0x1f8   :  { %617 = vrcp.f32 %v324_v54 }
 0x204   :  { %v616_v56 = vpop.eup %615 }
 0x205   :  { %v327_v57 = vmul.f32 %v616_v56, %v614_v55  ;;  %v618_v58 = vpop.eup %617 }
 0x207   :  { %619 = vtanh.f32 %v327_v57 }
 0x214   :  { %v620_v59 = vpop.eup %619 }
 0x215   :  { %v329_v60 = vmul.f32 %v620_v59, %v618_v58 }
 0x217   :  { %v330_v61 = vadd.f32 %v770_v37, %v329_v60 }
 0x219   :  { %v331_v62 = vpack.c.bf16 %v330_v61, %v330_v61 }
 0x21b   :  { %525 = vmatmul.mubr.msk.bf16.vlgmr.msra.gmra.mxu0 %vm229_vm4, %v331_v62  ;;  %562 = vmatmul.mubr.msk.bf16.vlgmr.msra.gmra.mxu1 %vm229_vm4, %v331_v62 }
 0x21c   :  { %569 = vmatprep.mubr.msk.bf16.mxu0 %vm728_vm0, %v727_v1  ;;  %566 = vmatpush3.bf16.msra.mxu0 %v595_v63 }
 0x21d   :  { %567 = vmatprep.subr.bf16.mxu0 %v727_v1 }
 0x220   :  { %568 = vmatpush3.bf16.msra.mxu0 %v596_v0 }
 0x2db   :  { %v369_v2 = vpop.f32.mrf.mxu0  ;;  %v410_v3 = vpop.f32.mrf.mxu1 }
 0x2dc   :  { %v527_v4 = vmul.f32 -1.442695, %v369_v2  ;;  %v528_v11 = vmul.f32 -1.442695, %v410_v3 }
 0x2dd   :  { %v371_v5 = vpop.f32.mrf.mxu0  ;;  %v563_v6 = vpop.f32.mrf.mxu1 }
 0x2de   :  { %621 = vpow2.f32 %v527_v4 }
 0x2df   :  { %v373_v7 = vpop.f32.mrf.mxu0  ;;  %v413_v8 = vpop.f32.mrf.mxu1  ;;  %623 = vpow2.f32 %v528_v11 }
 0x2e0   :  { %625 = vtanh.f32 %v371_v5 }
 0x2e1   :  { %v374_v9 = vpop.f32.mrf.mxu0  ;;  %v564_v10 = vpop.f32.mrf.mxu1 }
 0x2eb   :  { %v622_v12 = vpop.eup %621 }
 0x2ec   :  { %v419_v13 = vadd.f32 1.0, %v622_v12  ;;  %v624_v14 = vpop.eup %623 }
 0x2ed   :  { %v426_v15 = vadd.f32 1.0, %v624_v14  ;;  %v626_v1 = vpop.eup %625 }
 0x2ee   :  { %627 = vrcp.f32 %v419_v13 }
 0x2ef   :  { %629 = vrcp.f32 %v426_v15 }
 0x2fb   :  { %v628_v16 = vpop.eup %627 }
 0x2fc   :  { %v429_v17 = vmul.f32 %v628_v16, %v626_v1  ;;  %v630_v18 = vpop.eup %629 }
 0x2fe   :  { %631 = vtanh.f32 %v429_v17 }
 0x30b   :  { %v632_v19 = vpop.eup %631 }
 0x30c   :  { %v431_v20 = vmul.f32 %v632_v19, %v630_v18 }
 0x30e   :  { %v432_v21 = vadd.f32 %v770_v37, %v431_v20 }
 0x310   :  { %v433_v22 = vpack.c.bf16 %v432_v21, %v432_v21 }
 0x312   :  { %570 = vmatmul.mubr.msk.bf16.vlgmr.msra.gmra.mxu0 %vm229_vm4, %v433_v22 }
 0x3d2   :  { %v483_v23 = vpop.f32.mrf.mxu0 }
 0x3d3   :  { %489 = vst [vmem:[#allocation8] sm:$0x3] %v483_v23 }
 0x3d4   :  { %v571_v24 = vpop.f32.mrf.mxu0 }
 0x3d5   :  { %704 = shalt.err (!%p701_p5)
}
 0x3d6   :  { %499 = dma.vmem_to_hbm [thread:$0]  %s497_s2, 32, %s794_s3, [#allocation4]   ;;  %v486_v25 = vpop.f32.mrf.mxu0 }
 0x3d8   :  { %v572_v26 = vpop.f32.mrf.mxu0 }
 0x3d9   :  { %717 = dma.done.wait [#allocation4], 32  }
 0x3da   :  { %718 = vsyncadd [#allocation4], 4294967264 }
 0x3db   :  { %503 = vsyncpa [#allocation3], 1 }
 0x3dc   :  { %504 = vsyncpa [#allocation6], 1 }
 0x3dd   :  { %505 = vsyncpa [#allocation4], 1 }

</bundles_post_ra>
